<compile_context>
chip_gen: v6e
topology: v6e:2x2x1
jax: 0.10.0
libtpu: 0.0.40
codegen_flags: <defaults>
</compile_context>

<pallas_src>
import functools

import jax
import jax.numpy as jnp
from jax.experimental import pallas as pl
from jax.experimental.pallas import tpu as pltpu

_LANE = 128


def _cam_constrain_kernel(cam_ref, mask_ref, num_ref, den_ref, num_acc, den_acc,
                          *, total_rows):
    # cam_ref:  (1, C, R, 128) cam in its native dtype (f32 / bf16 / ...)
    # mask_ref: (1, R, 128)    int8 (0/1)
    # num_ref / den_ref: (1, 1, C) float32 outputs, resident across the S axis
    # num_acc / den_acc: (1, C, G, 128) float32 VMEM accumulators (G = 8 or 1)
    s = pl.program_id(1)

    @pl.when(s == 0)
    def _():
        num_acc[...] = jnp.zeros_like(num_acc)
        den_acc[...] = jnp.zeros_like(den_acc)

    cam = jnp.abs(cam_ref[...])                       # abs in native dtype
    _, C, R, L = cam.shape

    # Ragged last S tile: zero out-of-range rows with a select (NOT a multiply,
    # so OOB garbage NaN/Inf cannot poison the sums). Static no-op when the
    # block rows divide total_rows.
    if total_rows % R != 0:
        row = jax.lax.broadcasted_iota(jnp.int32, (1, 1, R, L), 2)
        valid = (s * R + row) < total_rows
        cam = jnp.where(valid, cam, jnp.zeros_like(cam))

    # Mask multiply. mask is exactly 0/1, so a bf16 product is exact: keep the
    # VALU work in bf16 for bf16 inputs (2 elem/lane/cycle on v6e/v7x); f32
    # otherwise. Accumulation is always f32.
    if cam.dtype == jnp.bfloat16:
        mask = mask_ref[...].astype(jnp.bfloat16)[:, None, :, :]   # (1,1,R,128)
        prod = (cam * mask).astype(jnp.float32)                    # (1,C,R,128)
        camf = cam.astype(jnp.float32)
    else:
        camf = cam.astype(jnp.float32)
        mask = mask_ref[...].astype(jnp.float32)[:, None, :, :]
        prod = camf * mask

    # TODO(synk): on v7x, replace the VPU multiply+reduce below with one MXU
    # contraction |cam|(C, R*128) @ [mask, ones](R*128, 2) per tile.
    G = num_acc.shape[2]
    if G == 8:
        # vreg-shaped partials: pure VALU vreg adds, no per-tile XLU reduce.
        num_acc[...] += prod.reshape(1, C, R // 8, 8, L).sum(axis=2)
        den_acc[...] += camf.reshape(1, C, R // 8, 8, L).sum(axis=2)
    else:
        # tiny-rows fallback (R not a multiple of 8): sublane-reduce per tile.
        num_acc[...] += prod.sum(axis=2, keepdims=True)
        den_acc[...] += camf.sum(axis=2, keepdims=True)

    @pl.when(s == pl.num_programs(1) - 1)
    def _():
        num = num_acc[...].sum(axis=2).sum(axis=-1)   # (1, C)
        den = den_acc[...].sum(axis=2).sum(axis=-1)   # (1, C)
        num_ref[...] = num[:, None, :]
        den_ref[...] = den[:, None, :]


def cam_constrain(cam, camlabel, weight=1.0, *, max_block_rows=None):
    """cam: (N, C, D, H, W) float; camlabel: (N, D, H, W) int -> (N,) float32."""
    N, C, D, H, W = cam.shape
    S = D * H * W

    # --- lane-dense layout (rows, 128); no pad when S is lane-aligned --------
    s_aligned = -(-S // _LANE) * _LANE
    cam_flat = cam.reshape(N, C, S)                      # native dtype
    mask_flat = (camlabel.reshape(N, S) != 0).astype(jnp.int8)
    if s_aligned != S:
        # TODO(synk): lane-unaligned S still pays one HBM rewrite of cam here;
        # switch to a flat (N, C, S) layout with in-kernel lane masking to
        # remove it entirely.
        pad = s_aligned - S
        cam_flat = jnp.pad(cam_flat, ((0, 0), (0, 0), (0, pad)))
        mask_flat = jnp.pad(mask_flat, ((0, 0), (0, pad)))
    rows = s_aligned // _LANE
    cam_tiled = cam_flat.reshape(N, C, rows, _LANE)      # metadata-only reshape
    mask_tiled = mask_flat.reshape(N, rows, _LANE)

    # --- tiling: ~8 MB of cam per step; rows/block a multiple of 32 (int8
    #     sublane tiling) unless a single block covers all rows --------------
    itemsize = jnp.dtype(cam.dtype).itemsize
    bytes_per_row = C * _LANE * itemsize
    target_bytes = 8 * 1024 * 1024
    r_target = max(32, (target_bytes // bytes_per_row // 32) * 32)
    if max_block_rows is not None:                       # test hook
        r_target = max(32, min(r_target, (max_block_rows // 32) * 32))
    r_block = rows if rows <= r_target else int(r_target)
    n_s_tiles = -(-rows // r_block)
    G = 8 if r_block % 8 == 0 else 1

    kernel = functools.partial(_cam_constrain_kernel, total_rows=rows)
    num, den = pl.pallas_call(
        kernel,
        out_shape=(jax.ShapeDtypeStruct((N, 1, C), jnp.float32),
                   jax.ShapeDtypeStruct((N, 1, C), jnp.float32)),
        grid_spec=pltpu.PrefetchScalarGridSpec(
            num_scalar_prefetch=0,
            grid=(N, n_s_tiles),
            in_specs=[
                pl.BlockSpec((1, C, r_block, _LANE), lambda n, s: (n, 0, s, 0)),
                pl.BlockSpec((1, r_block, _LANE), lambda n, s: (n, s, 0)),
            ],
            # Output blocks resident across the S (reduction) axis: one HBM
            # write per sample and per output.
            out_specs=[
                pl.BlockSpec((1, 1, C), lambda n, s: (n, 0, 0)),
                pl.BlockSpec((1, 1, C), lambda n, s: (n, 0, 0)),
            ],
            scratch_shapes=[
                pltpu.VMEM((1, C, G, _LANE), jnp.float32),   # num partials
                pltpu.VMEM((1, C, G, _LANE), jnp.float32),   # den partials
            ],
        ),
        compiler_params=pltpu.CompilerParams(
            dimension_semantics=("parallel", "arbitrary"),
            # 32 MiB: already the v6e/v7x default, raises v5e's 16 MiB default
            # so double-buffered 8 MB tiles fit everywhere.
            vmem_limit_bytes=32 * 1024 * 1024,
        ),
    )(cam_tiled, mask_tiled)

    # Tiny epilogue in XLA: divide / -log / mean / weight.
    upper_percent = num[:, 0, :] / den[:, 0, :]          # (N, C)
    loss = -jnp.log(upper_percent)
    return weight * jnp.mean(loss, axis=-1)


def _reference(cam, camlabel, weight=1.0):
    """Pure-JAX reference mirroring the PyTorch forward exactly."""
    cam = jnp.abs(cam.astype(jnp.float32))
    N, C, D, H, W = cam.shape
    mask = 1.0 - (camlabel == 0).astype(jnp.float32)      # (N, D, H, W)
    mask = mask[:, None]                                   # (N, 1, D, H, W)
    mask = jnp.broadcast_to(mask, cam.shape).reshape(N, C, -1)
    cam = cam.reshape(N, C, -1)
    upper = cam * mask
    upper_percent = upper.sum(axis=2) / cam.sum(axis=2)
    loss = -jnp.log(upper_percent)
    return weight * loss.mean(axis=1)


if __name__ == "__main__":
    key = jax.random.PRNGKey(0)
    k1, k2, k3, k4 = jax.random.split(key, 4)

    # Case 1: shapes implied by the module (small). Single S tile, G=1 path,
    # no padding (S = 256 is lane-aligned).
    N, C, D, H, W = 2, 4, 4, 8, 8
    cam = jax.random.normal(k1, (N, C, D, H, W), dtype=jnp.float32)
    camlabel = jax.random.randint(k2, (N, D, H, W), minval=0, maxval=3,
                                  dtype=jnp.int32)
    out = jax.block_until_ready(cam_constrain(cam, camlabel, weight=1.0))
    ref = jax.block_until_ready(_reference(cam, camlabel, weight=1.0))
    assert out.shape == (N,)
    assert jnp.allclose(out, ref, rtol=1e-5, atol=1e-5), (out, ref)

    # Case 2: exercises multi-tile streaming, the vreg-shaped (G=8) accumulator
    # path and the ragged-last-tile row mask (rows = 40, block rows = 32).
    N2, C2, D2, H2, W2 = 2, 4, 5, 32, 32
    cam2 = jax.random.normal(k3, (N2, C2, D2, H2, W2), dtype=jnp.float32)
    camlabel2 = jax.random.randint(k4, (N2, D2, H2, W2), minval=0, maxval=3,
                                   dtype=jnp.int32)
    out2 = jax.block_until_ready(
        cam_constrain(cam2, camlabel2, weight=0.5, max_block_rows=32))
    ref2 = jax.block_until_ready(_reference(cam2, camlabel2, weight=0.5))
    assert jnp.allclose(out2, ref2, rtol=1e-5, atol=1e-5), (out2, ref2)

    print("KERNEL_OK")
</pallas_src>

<mosaic_0001>
module attributes {stable_mosaic.version = 11 : i64} {
  func.func @_cam_constrain_kernel(%arg0: i32, %arg1: i32, %arg2: memref<1x4x2x128xf32, #tpu.memory_space<vmem>>, %arg3: memref<1x2x128xi8, #tpu.memory_space<vmem>>, %arg4: memref<1x1x4xf32, #tpu.memory_space<vmem>>, %arg5: memref<1x1x4xf32, #tpu.memory_space<vmem>>, %arg6: memref<1x4x1x128xf32, #tpu.memory_space<vmem>>, %arg7: memref<1x4x1x128xf32, #tpu.memory_space<vmem>>) attributes {dimension_semantics = [#tpu.dimension_semantics<parallel>, #tpu.dimension_semantics<arbitrary>], iteration_bounds = array<i64: 2, 1>, scalar_prefetch = 0 : i64, scratch_operands = 2 : i64, tpu.core_type = #tpu.core_type<tc>, window_params = [{transform_indices = @transform_0, window_bounds = array<i64: 1, 4, 2, 128>}, {transform_indices = @transform_1, window_bounds = array<i64: 1, 2, 128>}, {transform_indices = @transform_2, window_bounds = array<i64: 1, 1, 4>}, {transform_indices = @transform_3, window_bounds = array<i64: 1, 1, 4>}]} {
    %c0_i32 = arith.constant 0 : i32
    %0 = arith.cmpi eq, %arg1, %c0_i32 : i32
    %1 = arith.extui %0 : i1 to i32
    %c0_i32_0 = arith.constant 0 : i32
    %2 = arith.cmpi ne, %1, %c0_i32_0 : i32
    scf.if %2 {
      %cst_26 = arith.constant 0.000000e+00 : f32
      %23 = vector.broadcast %cst_26 : f32 to vector<1x4x1x128xf32>
      %c0_27 = arith.constant 0 : index
      %c0_28 = arith.constant 0 : index
      %c0_29 = arith.constant 0 : index
      %c0_30 = arith.constant 0 : index
      %24 = vector.load %arg6[%c0_27, %c0_28, %c0_29, %c0_30] : memref<1x4x1x128xf32, #tpu.memory_space<vmem>>, vector<1x4x1x128xf32>
      tpu.vector_store %arg6[%c0_27, %c0_28, %c0_29, %c0_30], %23 {strides = array<i32>} : memref<1x4x1x128xf32, #tpu.memory_space<vmem>>, vector<1x4x1x128xf32>,
      %cst_31 = arith.constant 0.000000e+00 : f32
      %25 = vector.broadcast %cst_31 : f32 to vector<1x4x1x128xf32>
      %c0_32 = arith.constant 0 : index
      %c0_33 = arith.constant 0 : index
      %c0_34 = arith.constant 0 : index
      %c0_35 = arith.constant 0 : index
      %26 = vector.load %arg7[%c0_32, %c0_33, %c0_34, %c0_35] : memref<1x4x1x128xf32, #tpu.memory_space<vmem>>, vector<1x4x1x128xf32>
      tpu.vector_store %arg7[%c0_32, %c0_33, %c0_34, %c0_35], %25 {strides = array<i32>} : memref<1x4x1x128xf32, #tpu.memory_space<vmem>>, vector<1x4x1x128xf32>,
    } else {
    }
    %c0 = arith.constant 0 : index
    %c0_1 = arith.constant 0 : index
    %c0_2 = arith.constant 0 : index
    %c0_3 = arith.constant 0 : index
    %3 = vector.load %arg2[%c0, %c0_1, %c0_2, %c0_3] : memref<1x4x2x128xf32, #tpu.memory_space<vmem>>, vector<1x4x2x128xf32>
    %4 = math.absf %3 : vector<1x4x2x128xf32>
    %c0_4 = arith.constant 0 : index
    %c0_5 = arith.constant 0 : index
    %c0_6 = arith.constant 0 : index
    %5 = vector.load %arg3[%c0_4, %c0_5, %c0_6] : memref<1x2x128xi8, #tpu.memory_space<vmem>>, vector<1x2x128xi8>
    %6 = arith.sitofp %5 : vector<1x2x128xi8> to vector<1x2x128xf32>
    %7 = vector.shape_cast %6 : vector<1x2x128xf32> to vector<1x1x2x128xf32>
    %8 = vector.broadcast %7 : vector<1x1x2x128xf32> to vector<1x4x2x128xf32>
    %9 = arith.mulf %4, %8 : vector<1x4x2x128xf32>
    %c0_7 = arith.constant 0 : index
    %c0_8 = arith.constant 0 : index
    %c0_9 = arith.constant 0 : index
    %c0_10 = arith.constant 0 : index
    %10 = vector.load %arg6[%c0_7, %c0_8, %c0_9, %c0_10] : memref<1x4x1x128xf32, #tpu.memory_space<vmem>>, vector<1x4x1x128xf32>
    %cst = arith.constant dense<0.000000e+00> : vector<1x4x128xf32>
    %11 = vector.multi_reduction <add>, %9, %cst [2] : vector<1x4x2x128xf32> to vector<1x4x128xf32>
    %12 = vector.shape_cast %11 : vector<1x4x128xf32> to vector<1x4x1x128xf32>
    %13 = arith.addf %10, %12 : vector<1x4x1x128xf32>
    %c0_11 = arith.constant 0 : index
    %c0_12 = arith.constant 0 : index
    %c0_13 = arith.constant 0 : index
    %c0_14 = arith.constant 0 : index
    %14 = vector.load %arg6[%c0_11, %c0_12, %c0_13, %c0_14] : memref<1x4x1x128xf32, #tpu.memory_space<vmem>>, vector<1x4x1x128xf32>
    tpu.vector_store %arg6[%c0_11, %c0_12, %c0_13, %c0_14], %13 {strides = array<i32>} : memref<1x4x1x128xf32, #tpu.memory_space<vmem>>, vector<1x4x1x128xf32>,
    %c0_15 = arith.constant 0 : index
    %c0_16 = arith.constant 0 : index
    %c0_17 = arith.constant 0 : index
    %c0_18 = arith.constant 0 : index
    %15 = vector.load %arg7[%c0_15, %c0_16, %c0_17, %c0_18] : memref<1x4x1x128xf32, #tpu.memory_space<vmem>>, vector<1x4x1x128xf32>
    %cst_19 = arith.constant dense<0.000000e+00> : vector<1x4x128xf32>
    %16 = vector.multi_reduction <add>, %4, %cst_19 [2] : vector<1x4x2x128xf32> to vector<1x4x128xf32>
    %17 = vector.shape_cast %16 : vector<1x4x128xf32> to vector<1x4x1x128xf32>
    %18 = arith.addf %15, %17 : vector<1x4x1x128xf32>
    %c0_20 = arith.constant 0 : index
    %c0_21 = arith.constant 0 : index
    %c0_22 = arith.constant 0 : index
    %c0_23 = arith.constant 0 : index
    %19 = vector.load %arg7[%c0_20, %c0_21, %c0_22, %c0_23] : memref<1x4x1x128xf32, #tpu.memory_space<vmem>>, vector<1x4x1x128xf32>
    tpu.vector_store %arg7[%c0_20, %c0_21, %c0_22, %c0_23], %18 {strides = array<i32>} : memref<1x4x1x128xf32, #tpu.memory_space<vmem>>, vector<1x4x1x128xf32>,
    %c0_i32_24 = arith.constant 0 : i32
    %20 = arith.cmpi eq, %arg1, %c0_i32_24 : i32
    %21 = arith.extui %20 : i1 to i32
    %c0_i32_25 = arith.constant 0 : i32
    %22 = arith.cmpi ne, %21, %c0_i32_25 : i32
    scf.if %22 {
      %c0_26 = arith.constant 0 : index
      %c0_27 = arith.constant 0 : index
      %c0_28 = arith.constant 0 : index
      %c0_29 = arith.constant 0 : index
      %23 = vector.load %arg6[%c0_26, %c0_27, %c0_28, %c0_29] : memref<1x4x1x128xf32, #tpu.memory_space<vmem>>, vector<1x4x1x128xf32>
      %cst_30 = arith.constant dense<0.000000e+00> : vector<1x4x128xf32>
      %24 = vector.multi_reduction <add>, %23, %cst_30 [2] : vector<1x4x1x128xf32> to vector<1x4x128xf32>
      %cst_31 = arith.constant dense<0.000000e+00> : vector<1x4xf32>
      %25 = vector.multi_reduction <add>, %24, %cst_31 [2] : vector<1x4x128xf32> to vector<1x4xf32>
      %c0_32 = arith.constant 0 : index
      %c0_33 = arith.constant 0 : index
      %c0_34 = arith.constant 0 : index
      %c0_35 = arith.constant 0 : index
      %26 = vector.load %arg7[%c0_32, %c0_33, %c0_34, %c0_35] : memref<1x4x1x128xf32, #tpu.memory_space<vmem>>, vector<1x4x1x128xf32>
      %cst_36 = arith.constant dense<0.000000e+00> : vector<1x4x128xf32>
      %27 = vector.multi_reduction <add>, %26, %cst_36 [2] : vector<1x4x1x128xf32> to vector<1x4x128xf32>
      %cst_37 = arith.constant dense<0.000000e+00> : vector<1x4xf32>
      %28 = vector.multi_reduction <add>, %27, %cst_37 [2] : vector<1x4x128xf32> to vector<1x4xf32>
      %29 = vector.shape_cast %25 : vector<1x4xf32> to vector<1x1x4xf32>
      %c0_38 = arith.constant 0 : index
      %c0_39 = arith.constant 0 : index
      %c0_40 = arith.constant 0 : index
      %30 = vector.load %arg4[%c0_38, %c0_39, %c0_40] : memref<1x1x4xf32, #tpu.memory_space<vmem>>, vector<1x1x4xf32>
      tpu.vector_store %arg4[%c0_38, %c0_39, %c0_40], %29 {strides = array<i32>} : memref<1x1x4xf32, #tpu.memory_space<vmem>>, vector<1x1x4xf32>,
      %31 = vector.shape_cast %28 : vector<1x4xf32> to vector<1x1x4xf32>
      %c0_41 = arith.constant 0 : index
      %c0_42 = arith.constant 0 : index
      %c0_43 = arith.constant 0 : index
      %32 = vector.load %arg5[%c0_41, %c0_42, %c0_43] : memref<1x1x4xf32, #tpu.memory_space<vmem>>, vector<1x1x4xf32>
      tpu.vector_store %arg5[%c0_41, %c0_42, %c0_43], %31 {strides = array<i32>} : memref<1x1x4xf32, #tpu.memory_space<vmem>>, vector<1x1x4xf32>,
    } else {
    }
    return
  }
  func.func @transform_0(%arg0: i32, %arg1: i32) -> (i32, i32, i32, i32) {
    %c0_i32 = arith.constant 0 : i32
    %c0_i32_0 = arith.constant 0 : i32
    %c0_i32_1 = arith.constant 0 : i32
    return %arg0, %c0_i32, %arg1, %c0_i32_0 : i32, i32, i32, i32
  }
  func.func @transform_1(%arg0: i32, %arg1: i32) -> (i32, i32, i32) {
    %c0_i32 = arith.constant 0 : i32
    %c0_i32_0 = arith.constant 0 : i32
    return %arg0, %arg1, %c0_i32 : i32, i32, i32
  }
  func.func @transform_2(%arg0: i32, %arg1: i32) -> (i32, i32, i32) {
    %c0_i32 = arith.constant 0 : i32
    %c0_i32_0 = arith.constant 0 : i32
    %c0_i32_1 = arith.constant 0 : i32
    return %arg0, %c0_i32, %c0_i32_0 : i32, i32, i32
  }
  func.func @transform_3(%arg0: i32, %arg1: i32) -> (i32, i32, i32) {
    %c0_i32 = arith.constant 0 : i32
    %c0_i32_0 = arith.constant 0 : i32
    %c0_i32_1 = arith.constant 0 : i32
    return %arg0, %c0_i32, %c0_i32_0 : i32, i32, i32
  }
}

</mosaic_0001>

<bundles_post_ra>
// kernel: tpu_custom_call.1
= control target key start
LH: loop header
LB: loop body
LE: loop exit
PB: predicated region body
PF: predicated region fallthrough
CT: control target
= control target key end

     0   :  { %9 = vsyncpa [#allocation5], 0  ;;  %s1126_s0 = inlined_call_operand.hbm [shape: f32[2,4,2,128], index: 0, kind: input, shape index: {}]   ;;  %s1127_s1 = inlined_call_operand.hbm [shape: s8[2,2,128], index: 1, kind: input, shape index: {}]   ;;  %s1128_s2 = inlined_call_operand.hbm [shape: f32[2,1,4], index: 2, kind: output, shape index: {0}]   ;;  %s1129_s3 = inlined_call_operand.hbm [shape: f32[2,1,4], index: 3, kind: output, shape index: {1}]  }
   0x1   :  { %11 = vsyncpa [#allocation5 + $0x1], 0 }
   0x2   :  { %12 = vsyncpa [#allocation8], 0 }
   0x3   :  { %14 = vsyncpa [#allocation8 + $0x1], 0 }
   0x4   :  { %15 = vsyncpa [#allocation6], 0 }
   0x5   :  { %17 = vsyncpa [#allocation6 + $0x1], 0 }
   0x6   :  { %18 = vsyncpa [#allocation11], 0 }
   0x7   :  { %20 = vsyncpa [#allocation11 + $0x1], 0  ;;  %s905_s12 = smov 0   ;;  %s907_s13 = smov 0  }
   0x8   :  { %s909_s14 = smov 0   ;;  %s911_s15 = smov 0  }
   0x9   :  { %s913_s16 = smov 0   ;;  %s915_s17 = smov 0  }
   0xa LB: > { %s614_s18 = sadd.s32 4294967295, %s875_s17   ;;  %s615_s19 = sadd.s32 4294967294, %s875_s17   ;;  %s875_s17 = sphi %s915_s17, %s26_s17   ;;  %s871_s16 = sphi %s913_s16, %s1141_s16   ;;  %s867_s15 = sphi %s911_s15, %s1140_s15   ;;  %s863_s14 = sphi %s909_s14, %s1139_s14   ;;  %s859_s13 = sphi %s907_s13, %s1138_s13   ;;  %s855_s12 = sphi %s905_s12, %s1137_s12  }
   0xb   : > { %s38_s20 = sadd.s32 1, %s871_s16  ;;  %s47_s21 = sadd.s32 1, %s863_s14 }
   0xc   : > { %p40_p0 = scmp.ge.s32.totalorder %s38_s20, 2  ;;  %p54_p1 = scmp.ne.s32.totalorder %s863_s14, %s859_s13 }
   0xd   : > { %p55_p2 = scmp.eq.s32.totalorder %s875_s17, 0  ;;  %p60_p3 = scmp.ne.s32.totalorder %s859_s13, %s855_s12 }
   0xe   : > { %s1143_s20 = smov (%p40_p0, %s38_s20), 0  ;;  %p61_p5 = scmp.eq.s32.totalorder %s614_s18, 0 }
   0xf   : > { %p946_p4 = por %p55_p2, %p54_p1  ;;  %s42_s23 = ssub.s32 %s871_s16, %s1143_s20 }
  0x10   : > { %p112_p6 = scmp.eq.s32.totalorder %s614_s18, 1  ;;  %p45_p7 = scmp.eq.s32.totalorder %s42_s23, 0 }
  0x11   : > { %p952_p8 = por %p61_p5, %p60_p3  ;;  %p118_p10 = scmp.eq.s32.totalorder %s615_s19, 1 }
  0x12   : > { %p956_p9 = por %p112_p6, %p54_p1  ;;  %p651_p13 = scmp.lt.s32.totalorder %s875_s17, 2 }
  0x13   : > { %s961_s26 = scalar_select %p45_p7, %s863_s14, %s47_s21  }
  0x14   : > { %p963_p11 = por %p118_p10, %p60_p3  ;;  %s970_s28 = sand.u32 1, %s863_s14  }
  0x15   : > { %s618_s29 = sshll.u32 %s970_s28, 3  ;;  %s628_s30 = sshll.u32 %s871_s16, 7 }
  0x16   : > { %s175_s6 = scalar_lea.hbm %s1126_s0, %s628_s30  ;;  %s168_s7 = scalar_lea.vmem [#allocation4], %s618_s29 }
  0x17   : > { %s176_s8 = sshll.u32 %s168_s7, 4  ;;  %p979_p0 = pnand %p651_p13, %p946_p4  ;;  %s177_s8 = int_to_ptr.vmem [resolvable:$true] %s176_s8 }
  0x18   : > { %p622_p1 = scmp.ge.s32.totalorder %s875_s17, 1  ;;  %s165_s10 = scalar_lea.sflag [#allocation5], %s970_s28 }
  0x19   : > { %p707_p2 = pneg %p979_p0  ;;  %s718_s11 = scalar_lea.vmem %s177_s8, 128 }
  0x1a   : > { %p719_p3 = scmp.ne.s32.totalorder %s177_s8, %s718_s11  ;;  %s877_s18 = smov [#allocation4]  }
  0x1b   : > { %s723_s19 = sshll.u32 %s877_s18, 4  ;;  %s724_s19 = int_to_ptr.vmem [resolvable:$false] %s723_s19 }
  0x1c   : > { %p721_p5 = pnand %p719_p3, %p707_p2  ;;  %s725_s21 = scalar_lea.vmem %s724_s19, 256 }
  0x1d   : > { %p726_p4 = scmp.lt.s32.totalorder %s177_s8, %s724_s19  ;;  %p727_p7 = scmp.lt.s32.totalorder %s725_s21, %s718_s11 }
  0x1e   : > { %p722_p6 = pneg %p721_p5 }
  0x1f   : > { %p728_p10 = por %p727_p7, %p726_p4 }
  0x21   : > { %p729_p13 = pnand %p728_p10, %p722_p6 }
  0x23   : > { %732 = shalt.err (!%p729_p13)
}
  0x24   : > { %s878_s22 = smov 32   ;;  %s879_s23 = smov 2  }
  0x25   : > { %640 = dma.hbm_to_vmem [thread:$0]  (!%p979_p0), %s175_s6, 128, %s177_s8, %s165_s10, %s878_s22, %s878_s22, %s879_s23  }
  0x26   : > { %p202_p3 = scmp.lt.s32.totalorder %s875_s17, 3  ;;  %s621_s29 = sshll.u32 %s871_s16, 4 }
  0x27   : > { %s195_s7 = scalar_lea.hbm %s1127_s1, %s621_s29  ;;  %s189_s11 = scalar_lea.vmem [#allocation7], %s970_s28 }
  0x28   : > { %p996_p5 = pnand %p622_p1, %p202_p3  ;;  %s197_s18 = sshll.u32 %s189_s11, 4  ;;  %s198_s18 = int_to_ptr.vmem [resolvable:$true] %s197_s18 }
  0x29   : > { %s187_s19 = scalar_lea.sflag [#allocation8], %s970_s28  ;;  %s746_s21 = scalar_lea.vmem %s198_s18, 16 }
  0x2a   : > { %p747_p6 = scmp.ne.s32.totalorder %s198_s18, %s746_s21  ;;  %s880_s6 = smov [#allocation7]  }
  0x2b   : > { %s751_s8 = sshll.u32 %s880_s6, 4  ;;  %s752_s8 = int_to_ptr.vmem [resolvable:$false] %s751_s8 }
  0x2c   : > { %p749_p4 = pnand %p747_p6, %p707_p2  ;;  %s753_s10 = scalar_lea.vmem %s752_s8, 32 }
  0x2d   : > { %p754_p1 = scmp.lt.s32.totalorder %s198_s18, %s752_s8  ;;  %p755_p10 = scmp.lt.s32.totalorder %s753_s10, %s746_s21 }
  0x2e   : > { %p750_p7 = pneg %p749_p4 }
  0x2f   : > { %p756_p13 = por %p755_p10, %p754_p1 }
  0x31   : > { %p757_p3 = pnand %p756_p13, %p750_p7 }
  0x33   : > { %760 = shalt.err (!%p757_p3)
}
  0x34   : > { %643 = dma.hbm_to_vmem [thread:$0]  (!%p979_p0), %s195_s7, 16, %s198_s18, %s187_s19  }
  0x35   : > { %206 = sbr.rel (%p996_p5) target bundleno = 282 (0x11a), region = 28  ;;  %s1013_s28 = sand.u32 (!%p996_p5), 1, %s859_s13  }
  0x36   : > { %s623_s22 = sshll.u32 (!%p996_p5), %s1013_s28, 3  ;;  %s209_s23 = scalar_lea.sflag (!%p996_p5), [#allocation5], %s1013_s28 }
  0x37   : > { %s212_s29 = scalar_lea.vmem (!%p996_p5), [#allocation4], %s623_s22 }
  0x3a   : > { %838 = dma.done.wait (%p952_p8), %s209_s23, 128  }
  0x3b   : > { %840 = vsyncadd (%p952_p8), %s209_s23, 4294967168  ;;  %s218_s9 = scalar_lea.sflag [#allocation8], %s1013_s28  ;;  %s220_s30 = scalar_lea.vmem [#allocation7], %s1013_s28 }
  0x3c   : > { %842 = dma.done.wait (%p952_p8), %s218_s9, 16  }
  0x3d   : > { %844 = vsyncadd (%p952_p8), %s218_s9, 4294967280  ;;  %v378_v0 = vlaneseq  ;;  %v881_v1 = vmov 0.0   ;;  %v262_v5 = vld [vmem:[%s212_s29] sm:$0x3]  ;;  %v263_v6 = vld [vmem:[%s212_s29 + $0x2] sm:$0x3] }
  0x3e   : > { %254 = vst [vmem:[#allocation2] sm:$0x1] %v881_v1  ;;  %255 = vst [vmem:[#allocation2 + $0x1] sm:$0x1] %v881_v1  ;;  %v264_v7 = vld [vmem:[%s212_s29 + $0x4] sm:$0x3] }
  0x3f   : > { %256 = vst [vmem:[#allocation2 + $0x2] sm:$0x1] %v881_v1  ;;  %257 = vst [vmem:[#allocation2 + $0x3] sm:$0x1] %v881_v1  ;;  %v1027_v2 = vshrl.u32 %v378_v0, 7  ;;  %v444_v3 = vand.u32 127, %v378_v0 }
  0x40   : > { %258 = vst [vmem:[#allocation3] sm:$0x1] %v881_v1  ;;  %259 = vst [vmem:[#allocation3 + $0x1] sm:$0x1] %v881_v1  ;;  %v265_v8 = vld [vmem:[%s212_s29 + $0x6] sm:$0x3] }
  0x41   : > { %260 = vst [vmem:[#allocation3 + $0x2] sm:$0x1] %v881_v1  ;;  %261 = vst [vmem:[#allocation3 + $0x3] sm:$0x1] %v881_v1  ;;  %v1030_v4 = vsub.s32 %v444_v3, %v1027_v2  ;;  %v266_v9 = vand.u32 2147483647, %v262_v5 }
  0x42   : > { %v270_v10 = vld [vmem:[%s220_s30] sm:$0x1]  ;;  %v267_v11 = vand.u32 2147483647, %v263_v6  ;;  %v268_v12 = vand.u32 2147483647, %v264_v7 }
  0x43   : > { %v269_v13 = vand.u32 2147483647, %v265_v8  ;;  %v271_v14 = vunpack.c.0.s8 %v270_v10  ;;  %vm281_vm0 = vcmask 1041408   ;;  %vm398_vm1 = vcmask 1043456   ;;  %s624_s24 = sshll.u32 %s867_s15, 4  ;;  %s243_s4 = scalar_lea.vmem [#allocation9], %s1013_s28 }
  0x44   : > { %v322_v16 = vsel %vm281_vm0, %v266_v9, 0.0  ;;  %v329_v17 = vsel %vm281_vm0, %v267_v11, 0.0  ;;  %v336_v20 = vsel %vm281_vm0, %v268_v12, 0.0  ;;  %s476_s5 = sshll.u32 %s243_s4, 4  ;;  %vm450_vm2 = vcmask 24576   ;;  %s1049_s18 = scalar_lea.hbm %s1128_s2, %s624_s24  ;;  %s1051_s5 = int_to_ptr.vmem [resolvable:$true] %s476_s5 }
  0x45   : > { %v272_v15 = vcvt.s32.f32 %v271_v14  ;;  %v323_v18 = vrot.slane %v322_v16, 4  ;;  %v330_v19 = vrot.slane %v329_v17, 4  ;;  %v343_v21 = vsel %vm281_vm0, %v269_v13, 0.0  ;;  %v277_v0 = vld [vmem:[#allocation2] sm:$0x1]  ;;  %s249_s19 = scalar_lea.vmem [#allocation10], %s1013_s28 }
  0x46   : > { %v337_v28 = vrot.slane %v336_v20, 4  ;;  %v344_v29 = vrot.slane %v343_v21, 4  ;;  %v279_v14 = vld [vmem:[#allocation2 + $0x2] sm:$0x1]  ;;  %s1056_s21 = sshll.u32 %s249_s19, 4  ;;  %s460_s6 = scalar_lea.sflag [#allocation6], %s1013_s28  ;;  %s490_s21 = int_to_ptr.vmem [resolvable:$true] %s1056_s21 }
  0x47   : > { %v273_v22 = vmul.f32 %v272_v15, %v266_v9  ;;  %v274_v23 = vmul.f32 %v272_v15, %v267_v11  ;;  %v275_v24 = vmul.f32 %v272_v15, %v268_v12  ;;  %v276_v25 = vmul.f32 %v272_v15, %v269_v13  ;;  %v318_v62 = vld [vmem:[#allocation3] sm:$0x1]  ;;  %v319_v63 = vld [vmem:[#allocation3 + $0x1] sm:$0x1]  ;;  %v278_v13 = vld [vmem:[#allocation2 + $0x1] sm:$0x1] }
  0x48   : > { %v324_v26 = vadd.f32 %v323_v18, %v322_v16  ;;  %v331_v27 = vadd.f32 %v330_v19, %v329_v17  ;;  %v338_v40 = vadd.f32 %v337_v28, %v336_v20  ;;  %v345_v41 = vadd.f32 %v344_v29, %v343_v21  ;;  %v320_v1 = vld [vmem:[#allocation3 + $0x2] sm:$0x1]  ;;  %v321_v12 = vld [vmem:[#allocation3 + $0x3] sm:$0x1]  ;;  %v280_v15 = vld [vmem:[#allocation2 + $0x3] sm:$0x1] }
  0x49   : > { %v282_v30 = vsel %vm281_vm0, %v273_v22, 0.0  ;;  %v289_v31 = vsel %vm281_vm0, %v274_v23, 0.0  ;;  %v296_v32 = vsel %vm281_vm0, %v275_v24, 0.0  ;;  %v303_v33 = vsel %vm281_vm0, %v276_v25, 0.0  ;;  %s761_s8 = scalar_lea.vmem %s1051_s5, 16  ;;  %s883_s10 = smov [#allocation9]  }
  0x4a   : > { %v283_v34 = vrot.slane %v282_v30, 4  ;;  %v290_v35 = vrot.slane %v289_v31, 4  ;;  %v297_v36 = vrot.slane %v296_v32, 4  ;;  %v304_v37 = vrot.slane %v303_v33, 4  ;;  %p762_p8 = scmp.ne.s32.totalorder %s1051_s5, %s761_s8  ;;  %s765_s22 = sshll.u32 %s883_s10, 4  ;;  %s766_s22 = int_to_ptr.vmem [resolvable:$false] %s765_s22 }
  0x4b   : > { %v325_v38 = vrot.slane %v324_v26, 2  ;;  %v332_v39 = vrot.slane %v331_v27, 2  ;;  %v339_v48 = vrot.slane %v338_v40, 2  ;;  %v346_v49 = vrot.slane %v345_v41, 2  ;;  %s767_s23 = scalar_lea.vmem %s766_s22, 32  ;;  %p768_p5 = scmp.lt.s32.totalorder %s1051_s5, %s766_s22 }
  0x4c   : > { %v284_v42 = vadd.f32 %v283_v34, %v282_v30  ;;  %v291_v43 = vadd.f32 %v290_v35, %v289_v31  ;;  %v298_v44 = vadd.f32 %v297_v36, %v296_v32  ;;  %v305_v45 = vadd.f32 %v304_v37, %v303_v33  ;;  %p763_p0 = pnand %p762_p8, %p956_p9  ;;  %p769_p6 = scmp.lt.s32.totalorder %s767_s23, %s761_s8 }
  0x4d   : > { %v326_v46 = vadd.f32 %v325_v38, %v324_v26  ;;  %v333_v47 = vadd.f32 %v332_v39, %v331_v27  ;;  %v340_v56 = vadd.f32 %v339_v48, %v338_v40  ;;  %v347_v57 = vadd.f32 %v346_v49, %v345_v41 }
  0x4e   : > { %v285_v50 = vrot.slane %v284_v42, 2  ;;  %v292_v51 = vrot.slane %v291_v43, 2  ;;  %v299_v52 = vrot.slane %v298_v44, 2  ;;  %v306_v53 = vrot.slane %v305_v45, 2  ;;  %p764_p2 = pneg %p763_p0  ;;  %p770_p4 = por %p769_p6, %p768_p5 }
  0x4f   : > { %v327_v54 = vrot.slane %v326_v46, 1  ;;  %v334_v55 = vrot.slane %v333_v47, 1  ;;  %v341_v6 = vrot.slane %v340_v56, 1  ;;  %v348_v7 = vrot.slane %v347_v57, 1 }
  0x50   : > { %v286_v58 = vadd.f32 %v285_v50, %v284_v42  ;;  %v293_v59 = vadd.f32 %v292_v51, %v291_v43  ;;  %v300_v60 = vadd.f32 %v299_v52, %v298_v44  ;;  %v307_v61 = vadd.f32 %v306_v53, %v305_v45  ;;  %p771_p7 = pnand %p770_p4, %p764_p2 }
  0x51   : > { %v328_v3 = vadd.f32 %v327_v54, %v326_v46  ;;  %v335_v5 = vadd.f32 %v334_v55, %v333_v47  ;;  %v342_v16 = vadd.f32 %v341_v6, %v340_v56  ;;  %v349_v17 = vadd.f32 %v348_v7, %v347_v57 }
  0x52   : > { %v287_v8 = vrot.slane %v286_v58, 1  ;;  %v294_v9 = vrot.slane %v293_v59, 1  ;;  %v301_v10 = vrot.slane %v300_v60, 1  ;;  %v308_v11 = vrot.slane %v307_v61, 1 }
  0x53   : > { %v350_v18 = vadd.f32 %v328_v3, %v318_v62  ;;  %v351_v19 = vadd.f32 %v335_v5, %v319_v63  ;;  %v882_v24 = vmov 1966171168   ;;  %v352_v26 = vadd.f32 %v342_v16, %v320_v1 }
  0x54   : > { %v288_v20 = vadd.f32 %v287_v8, %v286_v58  ;;  %v295_v21 = vadd.f32 %v294_v9, %v293_v59  ;;  %v302_v22 = vadd.f32 %v301_v10, %v300_v60  ;;  %v309_v23 = vadd.f32 %v308_v11, %v307_v61 }
  0x55   : > { %v376_v25 = vunpack.c.l.s4 %v882_v24  ;;  %v353_v27 = vadd.f32 %v349_v17, %v321_v12  ;;  %354 = vst [vmem:[#allocation3] sm:$0x1] %v350_v18  ;;  %355 = vst [vmem:[#allocation3 + $0x1] sm:$0x1] %v351_v19 }
  0x56   : > { %v310_v28 = vadd.f32 %v288_v20, %v277_v0  ;;  %v311_v29 = vadd.f32 %v295_v21, %v278_v13  ;;  %v312_v30 = vadd.f32 %v302_v22, %v279_v14  ;;  %v313_v31 = vadd.f32 %v309_v23, %v280_v15  ;;  %356 = vst [vmem:[#allocation3 + $0x2] sm:$0x1] %v352_v26 }
  0x57   : > { %357 = vst [vmem:[#allocation3 + $0x3] sm:$0x1] %v353_v27  ;;  %v377_v32 = vunpack.c.0.s8 %v376_v25 }
  0x58   : > { %314 = vst [vmem:[#allocation2] sm:$0x1] %v310_v28  ;;  %315 = vst [vmem:[#allocation2 + $0x1] sm:$0x1] %v311_v29 }
  0x59   : > { %316 = vst [vmem:[#allocation2 + $0x2] sm:$0x1] %v312_v30  ;;  %317 = vst [vmem:[#allocation2 + $0x3] sm:$0x1] %v313_v31  ;;  %v380_v35 = vsub.s32 %v377_v32, %v1027_v2 }
  0x5c   : > { %v402_v33 = vld [vmem:[#allocation3] sm:$0x1]  ;;  %v403_v34 = vld [vmem:[#allocation3 + $0x1] sm:$0x1] }
  0x5d   : > { %v414_v36 = vcombine.low %v402_v33, %v403_v34  ;;  %v404_v37 = vld [vmem:[#allocation3 + $0x2] sm:$0x1] }
  0x5e   : > { %v405_v38 = vld [vmem:[#allocation3 + $0x3] sm:$0x1] }
  0x5f   : > { %v361_v39 = vld [vmem:[#allocation2] sm:$0x1]  ;;  %v362_v40 = vld [vmem:[#allocation2 + $0x1] sm:$0x1]  ;;  %v415_v42 = vcombine.low %v404_v37, %v405_v38  ;;  %v422_v43 = vrot.slane %v414_v36, %v380_v35 }
  0x60   : > { %v363_v41 = vld [vmem:[#allocation2 + $0x2] sm:$0x1]  ;;  %v364_v44 = vld [vmem:[#allocation2 + $0x3] sm:$0x1]  ;;  %v373_v45 = vcombine.low %v361_v39, %v362_v40 }
  0x61   : > { %v374_v46 = vcombine.low %v363_v41, %v364_v44  ;;  %v429_v47 = vrot.slane %v415_v42, %v380_v35 }
  0x62   : > { %v381_v48 = vrot.slane %v373_v45, %v380_v35 }
  0x63   : > { %v388_v49 = vrot.slane %v374_v46, %v380_v35  ;;  %v430_v50 = vcombine.low %v422_v43, %v429_v47 }
  0x65   : > { %v389_v51 = vcombine.low %v381_v48, %v388_v49  ;;  %v437_v52 = vrot.slane %v430_v50, %v380_v35 }
  0x67   : > { %v396_v2 = vrot.slane %v389_v51, %v380_v35  ;;  %v439_v54 = vsel %vm398_vm1, %v437_v52, 0.0 }
  0x69   : > { %v399_v53 = vsel %vm398_vm1, %v396_v2, 0.0 }
  0x6a   : > { %400 = vadd.xlane.f32.xlu0 %v399_v53 }
  0x6e   : > { %440 = vadd.xlane.f32.xlu0 %v439_v54 }
  0xf3   : > { %v401_v55 = vpop.xlane.xlu0 %400 }
  0xf4   : > { %v448_v56 = vrot.slane %v401_v55, %v1030_v4 }
  0xf6   : > { %451 = vst.msk [vmem:[%s243_s4] sm:$0x1] %vm450_vm2, %v448_v56 }
  0xf7   : > { %v441_v57 = vpop.xlane.xlu0 %440 }
  0xf8   : > { %774 = shalt.err (!%p771_p7)
}
  0xf9   : > { %s775_s29 = scalar_lea.hbm %s1049_s18, 16  ;;  %s779_s4 = scalar_lea.hbm %s1128_s2, 32 }
  0xfa   : > { %p776_p1 = scmp.ne.s32.totalorder %s1049_s18, %s775_s29  ;;  %p780_p3 = scmp.lt.s32.totalorder %s1049_s18, %s1128_s2 }
  0xfb   : > { %p781_p8 = scmp.lt.s32.totalorder %s779_s4, %s775_s29 }
  0xfc   : > { %p777_p10 = pnand %p776_p1, %p956_p9 }
  0xfd   : > { %p782_p0 = por %p781_p8, %p780_p3 }
  0xfe   : > { %p778_p13 = pneg %p777_p10 }
 0x100   : > { %p783_p2 = pnand %p782_p0, %p778_p13 }
 0x102   : > { %786 = shalt.err (!%p783_p2)
}
 0x103   : > { %633 = dma.vmem_to_hbm [thread:$0]  (%p956_p9), %s1051_s5, 16, %s1049_s18, %s460_s6   ;;  %v456_v58 = vrot.slane %v441_v57, %v1030_v4 }
 0x104   : > { %s487_s22 = scalar_lea.hbm %s1129_s3, %s624_s24  ;;  %s464_s23 = scalar_lea.sflag [#allocation11], %s1013_s28 }
 0x105   : > { %458 = vst.msk [vmem:[%s249_s19] sm:$0x1] %vm450_vm2, %v456_v58  ;;  %s787_s29 = scalar_lea.vmem %s490_s21, 16  ;;  %s884_s9 = smov [#allocation10]  }
 0x106   : > { %p788_p5 = scmp.ne.s32.totalorder %s490_s21, %s787_s29  ;;  %s791_s30 = sshll.u32 %s884_s9, 4  ;;  %s792_s30 = int_to_ptr.vmem [resolvable:$false] %s791_s30 }
 0x107   : > { %s793_s5 = scalar_lea.vmem %s792_s30, 32  ;;  %p794_p7 = scmp.lt.s32.totalorder %s490_s21, %s792_s30 }
 0x108   : > { %p789_p6 = pnand %p788_p5, %p956_p9  ;;  %p795_p1 = scmp.lt.s32.totalorder %s793_s5, %s787_s29 }
 0x10a   : > { %p790_p4 = pneg %p789_p6  ;;  %p796_p10 = por %p795_p1, %p794_p7 }
 0x10c   : > { %p797_p13 = pnand %p796_p10, %p790_p4 }
 0x10e   : > { %800 = shalt.err (!%p797_p13)
}
 0x10f   : > { %s801_s15 = scalar_lea.hbm %s487_s22, 16  ;;  %s805_s18 = scalar_lea.hbm %s1129_s3, 32 }
 0x110   : > { %p802_p3 = scmp.ne.s32.totalorder %s487_s22, %s801_s15  ;;  %p806_p2 = scmp.lt.s32.totalorder %s487_s22, %s1129_s3 }
 0x111   : > { %p807_p5 = scmp.lt.s32.totalorder %s805_s18, %s801_s15 }
 0x112   : > { %p803_p8 = pnand %p802_p3, %p956_p9 }
 0x113   : > { %p808_p6 = por %p807_p5, %p806_p2 }
 0x114   : > { %p804_p0 = pneg %p803_p8 }
 0x116   : > { %p809_p12 = pnand %p808_p6, %p804_p0 }
 0x118   : > { %812 = shalt.err (!%p809_p12)
}
 0x119   : > { %634 = dma.vmem_to_hbm [thread:$0]  (%p956_p9), %s490_s21, 16, %s487_s22, %s464_s23  }
 0x11a PF: > { %s501_s4 = sand.u32 1, %s855_s12   ;;  %p1136_p4 = scmp.ge.s32.totalorder %s875_s17, 2 }
 0x11b   : > { %s502_s7 = scalar_lea.sflag [#allocation6], %s501_s4 }
 0x11c   : > { %p645_p7 = pnand %p1136_p4, %p963_p11 }
 0x11e   : > { %p646_p1 = pneg %p645_p7 }
 0x120   : > { %846 = dma.done.wait (%p646_p1), %s502_s7, 16  }
 0x121   : > { %848 = vsyncadd (%p646_p1), %s502_s7, 4294967280  ;;  %s510_s11 = scalar_lea.sflag [#allocation11], %s501_s4 }
 0x122   : > { %850 = dma.done.wait (%p646_p1), %s510_s11, 16  }
 0x123   : > { %852 = vsyncadd (%p646_p1), %s510_s11, 4294967280  ;;  %s26_s17 = sadd.s32 1, %s875_s17   ;;  %s1137_s12 = smov %s859_s13 }
 0x124   : > { %p23_p12 = scmp.ge.s32.totalorder %s26_s17, 4   ;;  %s1138_s13 = smov %s863_s14 }
 0x125   : > { %s1139_s14 = smov %s961_s26  ;;  %s1140_s15 = smov %s871_s16 }
 0x126   : > { %s1141_s16 = smov %s1143_s20  ;;  %25 = sbr.rel (!%p23_p12) target bundleno = 10 (0xa), region = 111 }
 0x12b   :  { %514 = vsyncpa [#allocation5], 1 }
 0x12c   :  { %516 = vsyncpa [#allocation5 + $0x1], 1 }
 0x12d   :  { %517 = vsyncpa [#allocation8], 1 }
 0x12e   :  { %519 = vsyncpa [#allocation8 + $0x1], 1 }
 0x12f   :  { %520 = vsyncpa [#allocation6], 1 }
 0x130   :  { %522 = vsyncpa [#allocation6 + $0x1], 1 }
 0x131   :  { %523 = vsyncpa [#allocation11], 1 }
 0x132   :  { %525 = vsyncpa [#allocation11 + $0x1], 1 }

</bundles_post_ra>
